<compile_context>
chip_gen: v7x
topology: tpu7x:2x2x1
jax: 0.10.0
libtpu: 0.0.40
codegen_flags: <defaults>
</compile_context>

<pallas_src>
import functools

import jax
import jax.numpy as jnp
from jax.experimental import pallas as pl
from jax.experimental.pallas import tpu as pltpu

_LANE = 128
_CAP_ROWS = 1024          # max (S_tile) rows of 128 lanes per grid step (128K pixels)


def _one_to_n_kernel(w1_ref, w2_ref, x_ref, y1_ref, y2_ref, *,
                     c_in, c_out1, c_out2):
    # x_ref: (C_in, S_tile, 128) dense VMEM tile.
    # w*_ref: (C_out, C_in) float32 scalars in SMEM.
    # Load each input channel once as a dense (S_tile, 128) slab, promote to f32.
    xc = [x_ref[c].astype(jnp.float32) for c in range(c_in)]

    def mix_into(w_ref, y_ref, c_out):
        for o in range(c_out):
            acc = w_ref[o, 0] * xc[0]
            for c in range(1, c_in):
                acc = acc + w_ref[o, c] * xc[c]
            # Direct per-channel store (no concatenate / sublane shuffle).
            y_ref[o] = acc.astype(y_ref.dtype)

    mix_into(w1_ref, y1_ref, c_out1)
    mix_into(w2_ref, y2_ref, c_out2)


def one_to_n_forward(x, w1, w2):
    """x: (B, C, H, W) NCHW; w1/w2: (Cout, C, 1, 1) PyTorch Conv2d weights."""
    B, C, H, W = x.shape
    c_out1, c_out2 = w1.shape[0], w2.shape[0]
    HW = H * W

    rows = -(-HW // _LANE)                       # ceil(HW / 128)
    if rows <= _CAP_ROWS:
        s_tile = rows                            # block == full axis (always legal)
        rows_p = rows
    else:
        s_tile = _CAP_ROWS                       # multiple of 8
        rows_p = -(-rows // s_tile) * s_tile
    hw_p = rows_p * _LANE

    xf = x.reshape(B, C, HW)
    if hw_p != HW:
        # TODO(synk): mask the final tile's store in-kernel instead of padding,
        # to avoid the extra HBM round-trip when H*W is not a multiple of 128.
        xf = jnp.pad(xf, ((0, 0), (0, 0), (0, hw_p - HW)))
    xf = xf.reshape(B, C, rows_p, _LANE)         # spatial dense on sublane+lane

    w1f = w1.reshape(c_out1, C).astype(jnp.float32)
    w2f = w2.reshape(c_out2, C).astype(jnp.float32)

    kernel = functools.partial(_one_to_n_kernel,
                               c_in=C, c_out1=c_out1, c_out2=c_out2)

    grid = (B, rows_p // s_tile)
    y1, y2 = pl.pallas_call(
        kernel,
        out_shape=(jax.ShapeDtypeStruct((B, c_out1, rows_p, _LANE), x.dtype),
                   jax.ShapeDtypeStruct((B, c_out2, rows_p, _LANE), x.dtype)),
        grid_spec=pltpu.PrefetchScalarGridSpec(
            num_scalar_prefetch=0,
            grid=grid,
            in_specs=[
                pl.BlockSpec(memory_space=pltpu.MemorySpace.SMEM),   # w1 (3x3)
                pl.BlockSpec(memory_space=pltpu.MemorySpace.SMEM),   # w2 (3x3)
                pl.BlockSpec((None, C, s_tile, _LANE),
                             lambda b, i: (b, 0, i, 0)),
            ],
            out_specs=(
                pl.BlockSpec((None, c_out1, s_tile, _LANE),
                             lambda b, i: (b, 0, i, 0)),
                pl.BlockSpec((None, c_out2, s_tile, _LANE),
                             lambda b, i: (b, 0, i, 0)),
            ),
        ),
        compiler_params=pltpu.CompilerParams(
            dimension_semantics=("parallel", "parallel"),
            vmem_limit_bytes=40 << 20),
    )(w1f, w2f, xf)

    y1 = y1.reshape(B, c_out1, hw_p)
    y2 = y2.reshape(B, c_out2, hw_p)
    if hw_p != HW:
        y1 = y1[:, :, :HW]
        y2 = y2[:, :, :HW]
    return y1.reshape(B, c_out1, H, W), y2.reshape(B, c_out2, H, W)


if __name__ == "__main__":
    key = jax.random.PRNGKey(0)
    k1, k2, k3 = jax.random.split(key, 3)

    B, C, H, W = 2, 3, 16, 16
    x = jax.random.normal(k1, (B, C, H, W), jnp.float32)
    # PyTorch Conv2d(3, 3, 1, 1, bias=False).weight has shape (3, 3, 1, 1)
    w1 = 0.5 * jax.random.normal(k2, (3, 3, 1, 1), jnp.float32)
    w2 = 0.5 * jax.random.normal(k3, (3, 3, 1, 1), jnp.float32)

    fwd = jax.jit(one_to_n_forward)
    y1, y2 = fwd(x, w1, w2)
    y1 = jax.block_until_ready(y1)
    y2 = jax.block_until_ready(y2)

    # plain-JAX reference (1x1 conv == channel einsum)
    r1 = jnp.einsum('oi,bihw->bohw', w1[:, :, 0, 0], x)
    r2 = jnp.einsum('oi,bihw->bohw', w2[:, :, 0, 0], x)

    assert y1.shape == (B, 3, H, W) and y2.shape == (B, 3, H, W)
    assert bool(jnp.all(jnp.isfinite(y1))) and bool(jnp.all(jnp.isfinite(y2)))
    assert bool(jnp.allclose(y1, r1, atol=1e-5, rtol=1e-5))
    assert bool(jnp.allclose(y2, r2, atol=1e-5, rtol=1e-5))
    print("KERNEL_OK")
</pallas_src>

<mosaic_0001>
module attributes {stable_mosaic.version = 11 : i64} {
  func.func @_one_to_n_kernel(%arg0: i32, %arg1: i32, %arg2: memref<3x3xf32, #tpu.memory_space<smem>>, %arg3: memref<3x3xf32, #tpu.memory_space<smem>>, %arg4: memref<1x3x2x128xf32, #tpu.memory_space<vmem>>, %arg5: memref<1x3x2x128xf32, #tpu.memory_space<vmem>>, %arg6: memref<1x3x2x128xf32, #tpu.memory_space<vmem>>) attributes {dimension_semantics = [#tpu.dimension_semantics<parallel>, #tpu.dimension_semantics<parallel>], iteration_bounds = array<i64: 2, 1>, scalar_prefetch = 0 : i64, scratch_operands = 0 : i64, tpu.core_type = #tpu.core_type<tc>, window_params = [{transform_indices = @transform_0, window_bounds = array<i64: 3, 3>}, {transform_indices = @transform_1, window_bounds = array<i64: 3, 3>}, {transform_indices = @transform_2, window_bounds = array<i64: 1, 3, 2, 128>}, {transform_indices = @transform_3, window_bounds = array<i64: 1, 3, 2, 128>}, {transform_indices = @transform_4, window_bounds = array<i64: 1, 3, 2, 128>}]} {
    %c0 = arith.constant 0 : index
    %c0_0 = arith.constant 0 : index
    %c0_1 = arith.constant 0 : index
    %c0_2 = arith.constant 0 : index
    %0 = vector.load %arg4[%c0, %c0_0, %c0_1, %c0_2] : memref<1x3x2x128xf32, #tpu.memory_space<vmem>>, vector<1x1x2x128xf32>
    %1 = vector.shape_cast %0 : vector<1x1x2x128xf32> to vector<2x128xf32>
    %c0_3 = arith.constant 0 : index
    %c1 = arith.constant 1 : index
    %c0_4 = arith.constant 0 : index
    %c0_5 = arith.constant 0 : index
    %2 = vector.load %arg4[%c0_3, %c1, %c0_4, %c0_5] : memref<1x3x2x128xf32, #tpu.memory_space<vmem>>, vector<1x1x2x128xf32>
    %3 = vector.shape_cast %2 : vector<1x1x2x128xf32> to vector<2x128xf32>
    %c0_6 = arith.constant 0 : index
    %c2 = arith.constant 2 : index
    %c0_7 = arith.constant 0 : index
    %c0_8 = arith.constant 0 : index
    %4 = vector.load %arg4[%c0_6, %c2, %c0_7, %c0_8] : memref<1x3x2x128xf32, #tpu.memory_space<vmem>>, vector<1x1x2x128xf32>
    %5 = vector.shape_cast %4 : vector<1x1x2x128xf32> to vector<2x128xf32>
    %c0_9 = arith.constant 0 : index
    %c0_10 = arith.constant 0 : index
    %6 = memref.load %arg2[%c0_9, %c0_10] : memref<3x3xf32, #tpu.memory_space<smem>>
    %7 = vector.broadcast %6 : f32 to vector<2x128xf32>
    %8 = arith.mulf %7, %1 : vector<2x128xf32>
    %c0_11 = arith.constant 0 : index
    %c1_12 = arith.constant 1 : index
    %9 = memref.load %arg2[%c0_11, %c1_12] : memref<3x3xf32, #tpu.memory_space<smem>>
    %10 = vector.broadcast %9 : f32 to vector<2x128xf32>
    %11 = arith.mulf %10, %3 : vector<2x128xf32>
    %12 = arith.addf %8, %11 : vector<2x128xf32>
    %c0_13 = arith.constant 0 : index
    %c2_14 = arith.constant 2 : index
    %13 = memref.load %arg2[%c0_13, %c2_14] : memref<3x3xf32, #tpu.memory_space<smem>>
    %14 = vector.broadcast %13 : f32 to vector<2x128xf32>
    %15 = arith.mulf %14, %5 : vector<2x128xf32>
    %16 = arith.addf %12, %15 : vector<2x128xf32>
    %c0_15 = arith.constant 0 : index
    %c0_16 = arith.constant 0 : index
    %c0_17 = arith.constant 0 : index
    %c0_18 = arith.constant 0 : index
    %17 = vector.load %arg5[%c0_15, %c0_16, %c0_17, %c0_18] : memref<1x3x2x128xf32, #tpu.memory_space<vmem>>, vector<1x1x2x128xf32>
    %18 = vector.shape_cast %17 : vector<1x1x2x128xf32> to vector<2x128xf32>
    %19 = vector.shape_cast %16 : vector<2x128xf32> to vector<1x1x2x128xf32>
    tpu.vector_store %arg5[%c0_15, %c0_16, %c0_17, %c0_18], %19 {strides = array<i32>} : memref<1x3x2x128xf32, #tpu.memory_space<vmem>>, vector<1x1x2x128xf32>,
    %c1_19 = arith.constant 1 : index
    %c0_20 = arith.constant 0 : index
    %20 = memref.load %arg2[%c1_19, %c0_20] : memref<3x3xf32, #tpu.memory_space<smem>>
    %21 = vector.broadcast %20 : f32 to vector<2x128xf32>
    %22 = arith.mulf %21, %1 : vector<2x128xf32>
    %c1_21 = arith.constant 1 : index
    %c1_22 = arith.constant 1 : index
    %23 = memref.load %arg2[%c1_21, %c1_22] : memref<3x3xf32, #tpu.memory_space<smem>>
    %24 = vector.broadcast %23 : f32 to vector<2x128xf32>
    %25 = arith.mulf %24, %3 : vector<2x128xf32>
    %26 = arith.addf %22, %25 : vector<2x128xf32>
    %c1_23 = arith.constant 1 : index
    %c2_24 = arith.constant 2 : index
    %27 = memref.load %arg2[%c1_23, %c2_24] : memref<3x3xf32, #tpu.memory_space<smem>>
    %28 = vector.broadcast %27 : f32 to vector<2x128xf32>
    %29 = arith.mulf %28, %5 : vector<2x128xf32>
    %30 = arith.addf %26, %29 : vector<2x128xf32>
    %c0_25 = arith.constant 0 : index
    %c1_26 = arith.constant 1 : index
    %c0_27 = arith.constant 0 : index
    %c0_28 = arith.constant 0 : index
    %31 = vector.load %arg5[%c0_25, %c1_26, %c0_27, %c0_28] : memref<1x3x2x128xf32, #tpu.memory_space<vmem>>, vector<1x1x2x128xf32>
    %32 = vector.shape_cast %31 : vector<1x1x2x128xf32> to vector<2x128xf32>
    %33 = vector.shape_cast %30 : vector<2x128xf32> to vector<1x1x2x128xf32>
    tpu.vector_store %arg5[%c0_25, %c1_26, %c0_27, %c0_28], %33 {strides = array<i32>} : memref<1x3x2x128xf32, #tpu.memory_space<vmem>>, vector<1x1x2x128xf32>,
    %c2_29 = arith.constant 2 : index
    %c0_30 = arith.constant 0 : index
    %34 = memref.load %arg2[%c2_29, %c0_30] : memref<3x3xf32, #tpu.memory_space<smem>>
    %35 = vector.broadcast %34 : f32 to vector<2x128xf32>
    %36 = arith.mulf %35, %1 : vector<2x128xf32>
    %c2_31 = arith.constant 2 : index
    %c1_32 = arith.constant 1 : index
    %37 = memref.load %arg2[%c2_31, %c1_32] : memref<3x3xf32, #tpu.memory_space<smem>>
    %38 = vector.broadcast %37 : f32 to vector<2x128xf32>
    %39 = arith.mulf %38, %3 : vector<2x128xf32>
    %40 = arith.addf %36, %39 : vector<2x128xf32>
    %c2_33 = arith.constant 2 : index
    %c2_34 = arith.constant 2 : index
    %41 = memref.load %arg2[%c2_33, %c2_34] : memref<3x3xf32, #tpu.memory_space<smem>>
    %42 = vector.broadcast %41 : f32 to vector<2x128xf32>
    %43 = arith.mulf %42, %5 : vector<2x128xf32>
    %44 = arith.addf %40, %43 : vector<2x128xf32>
    %c0_35 = arith.constant 0 : index
    %c2_36 = arith.constant 2 : index
    %c0_37 = arith.constant 0 : index
    %c0_38 = arith.constant 0 : index
    %45 = vector.load %arg5[%c0_35, %c2_36, %c0_37, %c0_38] : memref<1x3x2x128xf32, #tpu.memory_space<vmem>>, vector<1x1x2x128xf32>
    %46 = vector.shape_cast %45 : vector<1x1x2x128xf32> to vector<2x128xf32>
    %47 = vector.shape_cast %44 : vector<2x128xf32> to vector<1x1x2x128xf32>
    tpu.vector_store %arg5[%c0_35, %c2_36, %c0_37, %c0_38], %47 {strides = array<i32>} : memref<1x3x2x128xf32, #tpu.memory_space<vmem>>, vector<1x1x2x128xf32>,
    %c0_39 = arith.constant 0 : index
    %c0_40 = arith.constant 0 : index
    %48 = memref.load %arg3[%c0_39, %c0_40] : memref<3x3xf32, #tpu.memory_space<smem>>
    %49 = vector.broadcast %48 : f32 to vector<2x128xf32>
    %50 = arith.mulf %49, %1 : vector<2x128xf32>
    %c0_41 = arith.constant 0 : index
    %c1_42 = arith.constant 1 : index
    %51 = memref.load %arg3[%c0_41, %c1_42] : memref<3x3xf32, #tpu.memory_space<smem>>
    %52 = vector.broadcast %51 : f32 to vector<2x128xf32>
    %53 = arith.mulf %52, %3 : vector<2x128xf32>
    %54 = arith.addf %50, %53 : vector<2x128xf32>
    %c0_43 = arith.constant 0 : index
    %c2_44 = arith.constant 2 : index
    %55 = memref.load %arg3[%c0_43, %c2_44] : memref<3x3xf32, #tpu.memory_space<smem>>
    %56 = vector.broadcast %55 : f32 to vector<2x128xf32>
    %57 = arith.mulf %56, %5 : vector<2x128xf32>
    %58 = arith.addf %54, %57 : vector<2x128xf32>
    %c0_45 = arith.constant 0 : index
    %c0_46 = arith.constant 0 : index
    %c0_47 = arith.constant 0 : index
    %c0_48 = arith.constant 0 : index
    %59 = vector.load %arg6[%c0_45, %c0_46, %c0_47, %c0_48] : memref<1x3x2x128xf32, #tpu.memory_space<vmem>>, vector<1x1x2x128xf32>
    %60 = vector.shape_cast %59 : vector<1x1x2x128xf32> to vector<2x128xf32>
    %61 = vector.shape_cast %58 : vector<2x128xf32> to vector<1x1x2x128xf32>
    tpu.vector_store %arg6[%c0_45, %c0_46, %c0_47, %c0_48], %61 {strides = array<i32>} : memref<1x3x2x128xf32, #tpu.memory_space<vmem>>, vector<1x1x2x128xf32>,
    %c1_49 = arith.constant 1 : index
    %c0_50 = arith.constant 0 : index
    %62 = memref.load %arg3[%c1_49, %c0_50] : memref<3x3xf32, #tpu.memory_space<smem>>
    %63 = vector.broadcast %62 : f32 to vector<2x128xf32>
    %64 = arith.mulf %63, %1 : vector<2x128xf32>
    %c1_51 = arith.constant 1 : index
    %c1_52 = arith.constant 1 : index
    %65 = memref.load %arg3[%c1_51, %c1_52] : memref<3x3xf32, #tpu.memory_space<smem>>
    %66 = vector.broadcast %65 : f32 to vector<2x128xf32>
    %67 = arith.mulf %66, %3 : vector<2x128xf32>
    %68 = arith.addf %64, %67 : vector<2x128xf32>
    %c1_53 = arith.constant 1 : index
    %c2_54 = arith.constant 2 : index
    %69 = memref.load %arg3[%c1_53, %c2_54] : memref<3x3xf32, #tpu.memory_space<smem>>
    %70 = vector.broadcast %69 : f32 to vector<2x128xf32>
    %71 = arith.mulf %70, %5 : vector<2x128xf32>
    %72 = arith.addf %68, %71 : vector<2x128xf32>
    %c0_55 = arith.constant 0 : index
    %c1_56 = arith.constant 1 : index
    %c0_57 = arith.constant 0 : index
    %c0_58 = arith.constant 0 : index
    %73 = vector.load %arg6[%c0_55, %c1_56, %c0_57, %c0_58] : memref<1x3x2x128xf32, #tpu.memory_space<vmem>>, vector<1x1x2x128xf32>
    %74 = vector.shape_cast %73 : vector<1x1x2x128xf32> to vector<2x128xf32>
    %75 = vector.shape_cast %72 : vector<2x128xf32> to vector<1x1x2x128xf32>
    tpu.vector_store %arg6[%c0_55, %c1_56, %c0_57, %c0_58], %75 {strides = array<i32>} : memref<1x3x2x128xf32, #tpu.memory_space<vmem>>, vector<1x1x2x128xf32>,
    %c2_59 = arith.constant 2 : index
    %c0_60 = arith.constant 0 : index
    %76 = memref.load %arg3[%c2_59, %c0_60] : memref<3x3xf32, #tpu.memory_space<smem>>
    %77 = vector.broadcast %76 : f32 to vector<2x128xf32>
    %78 = arith.mulf %77, %1 : vector<2x128xf32>
    %c2_61 = arith.constant 2 : index
    %c1_62 = arith.constant 1 : index
    %79 = memref.load %arg3[%c2_61, %c1_62] : memref<3x3xf32, #tpu.memory_space<smem>>
    %80 = vector.broadcast %79 : f32 to vector<2x128xf32>
    %81 = arith.mulf %80, %3 : vector<2x128xf32>
    %82 = arith.addf %78, %81 : vector<2x128xf32>
    %c2_63 = arith.constant 2 : index
    %c2_64 = arith.constant 2 : index
    %83 = memref.load %arg3[%c2_63, %c2_64] : memref<3x3xf32, #tpu.memory_space<smem>>
    %84 = vector.broadcast %83 : f32 to vector<2x128xf32>
    %85 = arith.mulf %84, %5 : vector<2x128xf32>
    %86 = arith.addf %82, %85 : vector<2x128xf32>
    %c0_65 = arith.constant 0 : index
    %c2_66 = arith.constant 2 : index
    %c0_67 = arith.constant 0 : index
    %c0_68 = arith.constant 0 : index
    %87 = vector.load %arg6[%c0_65, %c2_66, %c0_67, %c0_68] : memref<1x3x2x128xf32, #tpu.memory_space<vmem>>, vector<1x1x2x128xf32>
    %88 = vector.shape_cast %87 : vector<1x1x2x128xf32> to vector<2x128xf32>
    %89 = vector.shape_cast %86 : vector<2x128xf32> to vector<1x1x2x128xf32>
    tpu.vector_store %arg6[%c0_65, %c2_66, %c0_67, %c0_68], %89 {strides = array<i32>} : memref<1x3x2x128xf32, #tpu.memory_space<vmem>>, vector<1x1x2x128xf32>,
    return
  }
  func.func @transform_0(%arg0: i32, %arg1: i32) -> (i32, i32) {
    %c0_i32 = arith.constant 0 : i32
    %c0_i32_0 = arith.constant 0 : i32
    %c0_i32_1 = arith.constant 0 : i32
    return %c0_i32, %c0_i32_0 : i32, i32
  }
  func.func @transform_1(%arg0: i32, %arg1: i32) -> (i32, i32) {
    %c0_i32 = arith.constant 0 : i32
    %c0_i32_0 = arith.constant 0 : i32
    %c0_i32_1 = arith.constant 0 : i32
    return %c0_i32, %c0_i32_0 : i32, i32
  }
  func.func @transform_2(%arg0: i32, %arg1: i32) -> (i32, i32, i32, i32) {
    %c0_i32 = arith.constant 0 : i32
    %c0_i32_0 = arith.constant 0 : i32
    %c0_i32_1 = arith.constant 0 : i32
    return %arg0, %c0_i32, %arg1, %c0_i32_0 : i32, i32, i32, i32
  }
  func.func @transform_3(%arg0: i32, %arg1: i32) -> (i32, i32, i32, i32) {
    %c0_i32 = arith.constant 0 : i32
    %c0_i32_0 = arith.constant 0 : i32
    %c0_i32_1 = arith.constant 0 : i32
    return %arg0, %c0_i32, %arg1, %c0_i32_0 : i32, i32, i32, i32
  }
  func.func @transform_4(%arg0: i32, %arg1: i32) -> (i32, i32, i32, i32) {
    %c0_i32 = arith.constant 0 : i32
    %c0_i32_0 = arith.constant 0 : i32
    %c0_i32_1 = arith.constant 0 : i32
    return %arg0, %c0_i32, %arg1, %c0_i32_0 : i32, i32, i32, i32
  }
}

</mosaic_0001>

<bundles_post_ra>
// kernel: one_to_n_forward.1
= control target key start
LH: loop header
LB: loop body
LE: loop exit
PB: predicated region body
PF: predicated region fallthrough
CT: control target
= control target key end

     0   :  { %10 = vsyncpa [#allocation3], 0  ;;  %s780_s0 = inlined_call_operand.vmem [shape: f32[3,3], index: 0, kind: input, shape index: {}]   ;;  %s781_s1 = inlined_call_operand.vmem [shape: f32[3,3], index: 1, kind: input, shape index: {}]   ;;  %s782_s2 = inlined_call_operand.vmem [shape: f32[2,3,2,128], index: 2, kind: input, shape index: {}]   ;;  %s783_s3 = inlined_call_operand.vmem [shape: f32[2,3,2,128], index: 3, kind: output, shape index: {0}]   ;;  %s784_s4 = inlined_call_operand.vmem [shape: f32[2,3,2,128], index: 4, kind: output, shape index: {1}]  }
   0x1   :  { %11 = vsyncpa [#allocation5], 0  ;;  %s682_s15 = smov 0   ;;  %s684_s16 = smov 0  }
   0x2   :  { %s686_s17 = smov 0  }
   0x3 LB: > { %s511_s18 = sadd.s32 4294967295, %s653_s17   ;;  %s29_s19 = sadd.s32 1, %s649_s16  ;;  %s653_s17 = sphi %s686_s17, %s17_s17   ;;  %s649_s16 = sphi %s684_s16, %s794_s16   ;;  %s645_s15 = sphi %s682_s15, %s793_s15  }
   0x4   : > { %p31_p0 = scmp.ge.s32.totalorder %s29_s19, 2  ;;  %p513_p1 = scmp.ge.s32.totalorder %s653_s17, 1 }
   0x5   : > { %p160_p2 = scmp.lt.s32.totalorder %s653_s17, 3  ;;  %p707_p4 = scmp.eq.s32.totalorder %s511_s18, 0 }
   0x6   : > { %s796_s19 = smov (%p31_p0, %s29_s19), 0  ;;  %s173_s24 = sshll.u32 %s780_s0, 4  ;;  %s174_s24 = int_to_ptr.vmem [resolvable:$true] %s173_s24 }
   0x7   : > { %p703_p3 = pnand %p513_p1, %p160_p2  ;;  %s184_s27 = sshll.u32 %s781_s1, 4  ;;  %s185_s27 = int_to_ptr.vmem [resolvable:$true] %s184_s27 }
   0x8   : > { %s789_s21 = scalar_select %p707_p4, 1, 0 }
   0x9   : > { %s788_s20 = scalar_select %p703_p3, 1, 0 }
   0xa   : > { %p556_p5 = pneg %p703_p3  ;;  %s593_s29 = scalar_lea.vmem %s174_s24, 64 }
   0xb   : > { %p594_p7 = scmp.ne.s32.totalorder %s174_s24, %s593_s29  ;;  %p601_p11 = scmp.lt.s32.totalorder %s174_s24, %s174_s24 }
   0xc   : > { %p721_p6 = pnand %p707_p4, %p556_p5  ;;  %p602_p12 = scmp.lt.s32.totalorder %s593_s29, %s593_s29 }
   0xe   : > { %p595_p8 = pneg %p721_p6  ;;  %p603_p13 = por %p602_p12, %p601_p11 }
  0x10   : > { %p596_p9 = pnand %p595_p8, %p594_p7 }
  0x12   : > { %p597_p10 = pneg %p596_p9 }
  0x14   : > { %p604_p0 = pnand %p603_p13, %p597_p10 }
  0x16   : > { %607 = shalt.err (!%p604_p0)
}
  0x17   : > { %s655_s30 = smov [#allocation2]   ;;  %s608_s5 = scalar_lea.vmem %s185_s27, 64 }
  0x18   : > { %559 = dma.vmem_to_smem (!%p721_p6), %s174_s24, 64, %s655_s30, [#allocation3]  }
  0x19   : > { %p609_p1 = scmp.ne.s32.totalorder %s185_s27, %s608_s5  ;;  %p616_p4 = scmp.lt.s32.totalorder %s185_s27, %s185_s27 }
  0x1a   : > { %p617_p3 = scmp.lt.s32.totalorder %s608_s5, %s608_s5 }
  0x1b   : > { %p611_p2 = pnand %p609_p1, %p595_p8 }
  0x1c   : > { %p618_p7 = por %p617_p3, %p616_p4 }
  0x1d   : > { %p612_p5 = pneg %p611_p2 }
  0x1f   : > { %p619_p9 = pnand %p618_p7, %p612_p5 }
  0x21   : > { %622 = shalt.err (!%p619_p9)
}
  0x22   : > { %s656_s6 = smov [#allocation4]   ;;  %p791_p10 = scmp.ne.s32.totalorder %s788_s20, 0 }
  0x23   : > { %562 = dma.vmem_to_smem (!%p721_p6), %s185_s27, 64, %s656_s6, [#allocation5]  }
  0x24   : > { %208 = sbr.rel (%p791_p10) target bundleno = 73 (0x49), region = 32  ;;  %p792_p11 = scmp.ne.s32.totalorder (!%p791_p10), %s789_s21, 0 }
  0x2b   : > { %636 = dma.done.wait (%p792_p11), [#allocation3], 64  }
  0x2c   : > { %638 = vsyncadd (%p792_p11), [#allocation3], 4294967232 }
  0x2d   : > { %640 = dma.done.wait (%p792_p11), [#allocation5], 64  }
  0x2e   : > { %642 = vsyncadd (%p792_p11), [#allocation5], 4294967232 }
  0x2f   : > { %218 = sfence }
  0x30   : > { %p253_p3 = scmp.lt.s32.totalorder %s645_s15, 1  ;;  %s282_s7 = sld [smem:[#allocation2]] }
  0x31   : > { %s525_s8 = sld [smem:[#allocation2 + $0x1]]  ;;  %s526_s9 = sld [smem:[#allocation2 + $0x2]] }
  0x32   : > { %s798_s15 = smov (!%p253_p3, %s645_s15), 1  ;;  %s527_s10 = sld [smem:[#allocation2 + $0x80]] }
  0x33   : > { %s528_s11 = sld [smem:[#allocation2 + $0x81]]  ;;  %s743_s12 = smul.u32 6, %s798_s15 }
  0x34   : > { %s529_s13 = sld [smem:[#allocation2 + $0x82]]  ;;  %s745_s14 = sld [smem:[#allocation2 + $0x100]] }
  0x35   : > { %s747_s18 = sld [smem:[#allocation2 + $0x101]]  ;;  %s260_s22 = scalar_lea.vmem %s782_s2, %s743_s12 }
  0x36   : > { %v283_v0 = vstv %s282_s7  ;;  %s757_s25 = scalar_lea.vmem %s783_s3, %s743_s12  ;;  %v277_v1 = vld [vmem:[%s260_s22] sm:$0x3]  ;;  %v523_v2 = vld [vmem:[%s260_s22 + $0x2] sm:$0x3]  ;;  %v524_v3 = vld [vmem:[%s260_s22 + $0x4] sm:$0x3] }
  0x37   : > { %v286_v4 = vstv %s525_s8  ;;  %v284_v5 = vmul.f32 %v283_v0, %v277_v1  ;;  %v290_v7 = vstv %s526_s9  ;;  %s533_s15 = sld [smem:[#allocation2 + $0x102]]  ;;  %s320_s26 = sld [smem:[#allocation4]] }
  0x38   : > { %v287_v6 = vmul.f32 %v523_v2, %v286_v4  ;;  %v291_v8 = vmul.f32 %v524_v3, %v290_v7  ;;  %v295_v9 = vstv %s527_s10  ;;  %s535_s27 = sld [smem:[#allocation4 + $0x1]]  ;;  %s536_s28 = sld [smem:[#allocation4 + $0x2]] }
  0x39   : > { %v298_v10 = vstv %s528_s11  ;;  %v296_v12 = vmul.f32 %v295_v9, %v277_v1  ;;  %s537_s29 = sld [smem:[#allocation4 + $0x80]]  ;;  %s538_s30 = sld [smem:[#allocation4 + $0x81]] }
  0x3a   : > { %v288_v11 = vadd.f32 %v287_v6, %v284_v5  ;;  %v299_v13 = vmul.f32 %v523_v2, %v298_v10  ;;  %v302_v14 = vstv %s529_s13  ;;  %v308_v16 = vstv %s745_s14  ;;  %s539_s5 = sld [smem:[#allocation4 + $0x82]]  ;;  %s761_s6 = sld [smem:[#allocation4 + $0x100]] }
  0x3b   : > { %v303_v15 = vmul.f32 %v524_v3, %v302_v14  ;;  %v311_v17 = vstv %s747_s18  ;;  %v309_v20 = vmul.f32 %v308_v16, %v277_v1  ;;  %s542_s7 = sld [smem:[#allocation4 + $0x101]]  ;;  %s543_s8 = sld [smem:[#allocation4 + $0x102]] }
  0x3c   : > { %v292_v18 = vadd.f32 %v291_v8, %v288_v11  ;;  %v300_v19 = vadd.f32 %v299_v13, %v296_v12  ;;  %v312_v21 = vmul.f32 %v523_v2, %v311_v17  ;;  %s276_s11 = scalar_lea.vmem %s784_s4, %s743_s12 }
  0x3d   : > { %v315_v24 = vstv %s533_s15  ;;  %v321_v25 = vstv %s320_s26 }
  0x3e   : > { %293 = vst [vmem:[%s757_s25] sm:$0x3] %v292_v18  ;;  %v304_v22 = vadd.f32 %v303_v15, %v300_v19  ;;  %v313_v23 = vadd.f32 %v312_v21, %v309_v20  ;;  %v316_v26 = vmul.f32 %v524_v3, %v315_v24  ;;  %v322_v27 = vmul.f32 %v321_v25, %v277_v1 }
  0x3f   : > { %v324_v28 = vstv %s535_s27  ;;  %v328_v29 = vstv %s536_s28  ;;  %v333_v32 = vstv %s537_s29  ;;  %v336_v33 = vstv %s538_s30 }
  0x40   : > { %530 = vst [vmem:[%s757_s25 + $0x2] sm:$0x3] %v304_v22  ;;  %v325_v30 = vmul.f32 %v523_v2, %v324_v28  ;;  %v329_v31 = vmul.f32 %v524_v3, %v328_v29  ;;  %v317_v34 = vadd.f32 %v316_v26, %v313_v23  ;;  %v334_v35 = vmul.f32 %v333_v32, %v277_v1 }
  0x41   : > { %v337_v36 = vmul.f32 %v523_v2, %v336_v33  ;;  %v340_v37 = vstv %s539_s5  ;;  %v346_v40 = vstv %s761_s6  ;;  %v349_v41 = vstv %s542_s7 }
  0x42   : > { %v326_v38 = vadd.f32 %v325_v30, %v322_v27  ;;  %v341_v39 = vmul.f32 %v524_v3, %v340_v37  ;;  %534 = vst [vmem:[%s757_s25 + $0x4] sm:$0x3] %v317_v34  ;;  %v347_v43 = vmul.f32 %v346_v40, %v277_v1  ;;  %v350_v44 = vmul.f32 %v523_v2, %v349_v41 }
  0x43   : > { %v338_v42 = vadd.f32 %v337_v36, %v334_v35  ;;  %v353_v45 = vstv %s543_s8 }
  0x44   : > { %v330_v46 = vadd.f32 %v329_v31, %v326_v38  ;;  %v354_v47 = vmul.f32 %v524_v3, %v353_v45  ;;  %v351_v49 = vadd.f32 %v350_v44, %v347_v43 }
  0x45   : > { %v342_v48 = vadd.f32 %v341_v39, %v338_v42 }
  0x46   : > { %331 = vst [vmem:[%s276_s11] sm:$0x3] %v330_v46  ;;  %v355_v50 = vadd.f32 %v354_v47, %v351_v49 }
  0x47   : > { %540 = vst [vmem:[%s276_s11 + $0x2] sm:$0x3] %v342_v48 }
  0x48   : > { %544 = vst [vmem:[%s276_s11 + $0x4] sm:$0x3] %v355_v50 }
  0x49 PF: > { %s17_s17 = sadd.s32 1, %s653_s17   ;;  %s793_s15 = smov %s649_s16 }
  0x4a   : > { %p14_p4 = scmp.ge.s32.totalorder %s17_s17, 4   ;;  %s794_s16 = smov %s796_s19 }
  0x4c   :  { %16 = sbr.rel (!%p14_p4) target bundleno = 3 (0x3), region = 89 }
  0x53   :  { %407 = vsyncpa [#allocation3], 1 }
  0x54   :  { %409 = vsyncpa [#allocation3 + $0x1], 1 }
  0x55   :  { %410 = vsyncpa [#allocation5], 1 }

</bundles_post_ra>
